<compile_context>
chip_gen: v6e
topology: v6e:2x2x1
jax: 0.10.0
libtpu: 0.0.40
codegen_flags: <defaults>
</compile_context>

<pallas_src>
import jax
import jax.numpy as jnp
from jax.experimental import pallas as pl
from jax.experimental.pallas import tpu as pltpu


# ----------------------------- Pallas kernel ---------------------------------

def _make_fused_block_kernel(B, H, W, K, pad, dil, Cin, Cout):
    Hp = H + 2 * pad
    WCin = W * Cin
    WCout = W * Cout

    def kernel(xp_ref, t1_ref, t2_ref, td_ref, b1_ref, b2_ref, bd_ref,
               o_ref, h1p_ref):
        # Zero ONLY the row halo of the h1 scratch (interior is fully
        # rewritten every step).  Uninitialized VMEM elsewhere is never read.
        if pad > 0:
            zero_halo = jnp.zeros((B, pad, WCout), jnp.float32)
            h1p_ref[:, 0:pad, :] = zero_halo
            h1p_ref[:, pad + H:Hp, :] = zero_halo

        for b in range(B):
            # ---- conv1: K row-shifted Toeplitz matmuls (W-pad folded into T1)
            h1 = None
            for kh in range(K):
                lhs = xp_ref[b, kh * dil:kh * dil + H, :]          # (H, W*Cin)
                part = jnp.dot(lhs, t1_ref[kh],
                               preferred_element_type=jnp.float32)  # (H, W*Cout)
                h1 = part if h1 is None else h1 + part
            h1 = jnp.maximum(h1 + b1_ref[...], 0.0)   # relu1 (dropout1 = id)

            # keep h1 resident in VMEM, row-padded for conv2's kh shifts;
            # lane-aligned dense (H, 128) store.
            h1p_ref[b, pad:pad + H, :] = h1

            # ---- conv2: same Toeplitz scheme over the row-padded h1 --------
            out2 = None
            for kh in range(K):
                if kh * dil == pad:
                    lhs = h1                           # center tap: reuse vregs
                else:
                    lhs = h1p_ref[b, kh * dil:kh * dil + H, :]
                part = jnp.dot(lhs, t2_ref[kh],
                               preferred_element_type=jnp.float32)
                out2 = part if out2 is None else out2 + part
            out2 = jnp.maximum(out2 + b2_ref[...], 0.0)  # relu2 (dropout2 = id)

            # ---- residual: 1x1 conv (or identity) on the un-padded rows ----
            res = jnp.dot(xp_ref[b, pad:pad + H, :], td_ref[...],
                          preferred_element_type=jnp.float32) + bd_ref[...]

            o_ref[b] = jnp.maximum(out2 + res, 0.0)     # (H, W*Cout), lane-dense

    return kernel


# ------------------------------- JAX glue ------------------------------------

def weight_norm_effective(v, g):
    """weight_norm (dim=0): w = g * v / ||v||, norm over (Cin, KH, KW)."""
    norm = jnp.sqrt(jnp.sum(v * v, axis=(1, 2, 3), keepdims=True))
    return g[:, None, None, None] * v / norm


def _toeplitz_weight(w, W, pad, dil):
    """(Cout, Cin, K, K) -> (K, W*Cin, W*Cout) per-kh Toeplitz blocks.

    T[kh][js*Cin + c, j*Cout + co] = w[co, c, kh, kw] where js = j + kw*dil - pad
    (out-of-range js are simply omitted, absorbing the W-direction zero pad).
    """
    K = w.shape[2]
    js = jnp.arange(W)[None, :, None]
    j = jnp.arange(W)[None, None, :]
    kw = jnp.arange(K)[:, None, None]
    sel = (js == j + kw * dil - pad).astype(w.dtype)       # (K(kw), W(js), W(j))
    t = jnp.einsum('usj,ocku->kscjo', sel, w)              # (K, W, Cin, W, Cout)
    Cout, Cin = w.shape[0], w.shape[1]
    return t.reshape(K, W * Cin, W * Cout)


def _residual_weight(wd2, W):
    """(Cout, Cin) 1x1-conv weight -> (W*Cin, W*Cout) block-diagonal matrix."""
    Cout, Cin = wd2.shape
    t = jnp.einsum('sj,oc->scjo', jnp.eye(W, dtype=wd2.dtype), wd2)
    return t.reshape(W * Cin, W * Cout)


def genre_block_forward(x_nchw, params, images_per_step=None):
    """Forward pass of GenreClassifierBlockBertMod (NCHW in, NCHW out)."""
    N, Cin, H, W = x_nchw.shape
    K = params['kernel_size']
    pad = params['padding']
    dil = params['dilation']
    stride = params.get('stride', 1)
    assert stride == 1, "stride > 1 unsupported (residual add needs same dims)"
    assert 2 * pad == dil * (K - 1), "stride-1 'same' conv required for residual"

    w1 = weight_norm_effective(params['v1'], params['g1'])   # (Cout, Cin, K, K)
    w2 = weight_norm_effective(params['v2'], params['g2'])   # (Cout, Cout, K, K)
    Cout = w1.shape[0]
    Hp = H + 2 * pad
    WCin, WCout = W * Cin, W * Cout

    # ---- Toeplitz-packed weights (W padding folded in) -----------------------
    t1 = _toeplitz_weight(w1, W, pad, dil)                    # (K, W*Cin,  W*Cout)
    t2 = _toeplitz_weight(w2, W, pad, dil)                    # (K, W*Cout, W*Cout)
    if params['wd'] is not None:
        wd2 = params['wd'][:, :, 0, 0]                        # (Cout, Cin)
        bd = params['bd']
    else:                       # n_inputs == n_outputs: residual is x itself
        assert Cin == Cout
        wd2 = jnp.eye(Cout, dtype=jnp.float32)
        bd = jnp.zeros((Cout,), jnp.float32)
    td = _residual_weight(wd2, W)                             # (W*Cin, W*Cout)

    b1_row = jnp.tile(params['b1'], W)[None, :]               # (1, W*Cout)
    b2_row = jnp.tile(params['b2'], W)[None, :]
    bd_row = jnp.tile(bd, W)[None, :]

    # ---- input: NCHW -> lane-packed (N, Hp, W*Cin); pad only along H ---------
    xp = jnp.transpose(x_nchw, (0, 2, 3, 1)).reshape(N, H, WCin)
    xp = jnp.pad(xp, ((0, 0), (pad, pad), (0, 0)))

    # ---- batch packing: B images per grid step -------------------------------
    B = images_per_step or min(N, 8)
    NG = pl.cdiv(N, B)
    Np = NG * B
    if Np != N:
        xp = jnp.pad(xp, ((0, Np - N), (0, 0), (0, 0)))

    kernel = _make_fused_block_kernel(B, H, W, K, pad, dil, Cin, Cout)

    flops = 2 * Np * H * WCout * (K * WCin + K * WCout + WCin)
    bytes_accessed = 4 * (xp.size + Np * H * WCout + t1.size + t2.size
                          + td.size + 3 * WCout)

    y = pl.pallas_call(
        kernel,
        out_shape=jax.ShapeDtypeStruct((Np, H, WCout), jnp.float32),
        grid_spec=pltpu.PrefetchScalarGridSpec(
            num_scalar_prefetch=0,
            grid=(NG,),
            in_specs=[
                pl.BlockSpec((B, Hp, WCin), lambda n: (n, 0, 0)),
                pl.BlockSpec((K, WCin, WCout), lambda n: (0, 0, 0)),
                pl.BlockSpec((K, WCout, WCout), lambda n: (0, 0, 0)),
                pl.BlockSpec((WCin, WCout), lambda n: (0, 0)),
                pl.BlockSpec((1, WCout), lambda n: (0, 0)),
                pl.BlockSpec((1, WCout), lambda n: (0, 0)),
                pl.BlockSpec((1, WCout), lambda n: (0, 0)),
            ],
            out_specs=pl.BlockSpec((B, H, WCout), lambda n: (n, 0, 0)),
            scratch_shapes=[
                pltpu.VMEM((B, Hp, WCout), jnp.float32),   # row-padded h1
            ],
        ),
        compiler_params=pltpu.CompilerParams(
            dimension_semantics=("parallel",),
        ),
        cost_estimate=pl.CostEstimate(flops=flops, transcendentals=0,
                                      bytes_accessed=bytes_accessed),
    )(xp, t1, t2, td, b1_row, b2_row, bd_row)

    # (Np, H, W*Cout) -> (N, Cout, H, W)
    y = y[:N].reshape(N, H, W, Cout)
    return jnp.transpose(y, (0, 3, 1, 2))


# --------------------------- reference (pure JAX) -----------------------------

def reference_forward(x, w1, b1, w2, b2, wd, bd, pad, dil):
    def conv(inp, w, p, d):
        return jax.lax.conv_general_dilated(
            inp, w, (1, 1), [(p, p), (p, p)], rhs_dilation=(d, d),
            dimension_numbers=('NCHW', 'OIHW', 'NCHW'))
    out = jnp.maximum(conv(x, w1, pad, dil) + b1[None, :, None, None], 0.0)
    out = jnp.maximum(conv(out, w2, pad, dil) + b2[None, :, None, None], 0.0)
    res = conv(x, wd, 0, 1) + bd[None, :, None, None]
    return jnp.maximum(out + res, 0.0)


# ---------------------------------- main --------------------------------------

if __name__ == "__main__":
    # Module config: 4 -> 8 channels, 3x3 conv, stride 1, padding 1, dilation 1,
    # dropout 0.25 (identity in eval).
    N, Cin, Cout, H, W = 2, 4, 8, 16, 16
    K, stride, pad, dil = 3, 1, 1, 1

    key = jax.random.PRNGKey(0)
    k = jax.random.split(key, 8)

    # Deterministic parameter init (mirrors normal_(0, 0.01) + weight_norm g).
    v1 = 0.01 * jax.random.normal(k[0], (Cout, Cin, K, K), jnp.float32)
    g1 = jnp.sqrt(jnp.sum(v1 * v1, axis=(1, 2, 3)))          # weight_norm default g
    b1 = 0.05 * jax.random.normal(k[1], (Cout,), jnp.float32)
    v2 = 0.01 * jax.random.normal(k[2], (Cout, Cout, K, K), jnp.float32)
    g2 = jnp.sqrt(jnp.sum(v2 * v2, axis=(1, 2, 3)))
    b2 = 0.05 * jax.random.normal(k[3], (Cout,), jnp.float32)
    wd = 0.01 * jax.random.normal(k[4], (Cout, Cin, 1, 1), jnp.float32)
    bd = 0.05 * jax.random.normal(k[5], (Cout,), jnp.float32)

    params = dict(v1=v1, g1=g1, b1=b1, v2=v2, g2=g2, b2=b2, wd=wd, bd=bd,
                  kernel_size=K, stride=stride, padding=pad, dilation=dil)

    x = jax.random.normal(k[6], (N, Cin, H, W), jnp.float32)

    y = jax.block_until_ready(genre_block_forward(x, params))

    # Correctness check against a pure-JAX (lax.conv) reference of the module.
    w1_eff = weight_norm_effective(v1, g1)
    w2_eff = weight_norm_effective(v2, g2)
    y_ref = reference_forward(x, w1_eff, b1, w2_eff, b2, wd, bd, pad, dil)
    assert y.shape == (N, Cout, H, W)
    assert jnp.allclose(y, y_ref, rtol=1e-4, atol=1e-4), "mismatch vs reference"

    print("KERNEL_OK")
</pallas_src>

<mosaic_0001>
module attributes {stable_mosaic.version = 11 : i64} {
  func.func @kernel(%arg0: i32, %arg1: memref<2x18x64xf32, #tpu.memory_space<vmem>>, %arg2: memref<3x64x128xf32, #tpu.memory_space<vmem>>, %arg3: memref<3x128x128xf32, #tpu.memory_space<vmem>>, %arg4: memref<64x128xf32, #tpu.memory_space<vmem>>, %arg5: memref<1x128xf32, #tpu.memory_space<vmem>>, %arg6: memref<1x128xf32, #tpu.memory_space<vmem>>, %arg7: memref<1x128xf32, #tpu.memory_space<vmem>>, %arg8: memref<2x16x128xf32, #tpu.memory_space<vmem>>, %arg9: memref<2x18x128xf32, #tpu.memory_space<vmem>>) attributes {dimension_semantics = [#tpu.dimension_semantics<parallel>], iteration_bounds = array<i64: 1>, scalar_prefetch = 0 : i64, scratch_operands = 1 : i64, tpu.core_type = #tpu.core_type<tc>, window_params = [{transform_indices = @transform_0, window_bounds = array<i64: 2, 18, 64>}, {pipeline_mode = #tpu.pipeline_mode<synchronous>, transform_indices = @transform_1, window_bounds = array<i64: 3, 64, 128>}, {pipeline_mode = #tpu.pipeline_mode<synchronous>, transform_indices = @transform_2, window_bounds = array<i64: 3, 128, 128>}, {pipeline_mode = #tpu.pipeline_mode<synchronous>, transform_indices = @transform_3, window_bounds = array<i64: 64, 128>}, {pipeline_mode = #tpu.pipeline_mode<synchronous>, transform_indices = @transform_4, window_bounds = array<i64: 1, 128>}, {pipeline_mode = #tpu.pipeline_mode<synchronous>, transform_indices = @transform_5, window_bounds = array<i64: 1, 128>}, {pipeline_mode = #tpu.pipeline_mode<synchronous>, transform_indices = @transform_6, window_bounds = array<i64: 1, 128>}, {transform_indices = @transform_7, window_bounds = array<i64: 2, 16, 128>}]} {
    %cst = arith.constant 0.000000e+00 : f32
    %0 = vector.broadcast %cst : f32 to vector<2x1x128xf32>
    %c0 = arith.constant 0 : index
    %c0_0 = arith.constant 0 : index
    %c0_1 = arith.constant 0 : index
    %1 = vector.load %arg9[%c0, %c0_0, %c0_1] : memref<2x18x128xf32, #tpu.memory_space<vmem>>, vector<2x1x128xf32>
    tpu.vector_store %arg9[%c0, %c0_0, %c0_1], %0 {strides = array<i32>} : memref<2x18x128xf32, #tpu.memory_space<vmem>>, vector<2x1x128xf32>,
    %c0_2 = arith.constant 0 : index
    %c17 = arith.constant 17 : index
    %c0_3 = arith.constant 0 : index
    %2 = vector.load %arg9[%c0_2, %c17, %c0_3] : memref<2x18x128xf32, #tpu.memory_space<vmem>>, vector<2x1x128xf32>
    tpu.vector_store %arg9[%c0_2, %c17, %c0_3], %0 {strides = array<i32>} : memref<2x18x128xf32, #tpu.memory_space<vmem>>, vector<2x1x128xf32>,
    %c0_4 = arith.constant 0 : index
    %c0_5 = arith.constant 0 : index
    %c0_6 = arith.constant 0 : index
    %3 = vector.load %arg1[%c0_4, %c0_5, %c0_6] : memref<2x18x64xf32, #tpu.memory_space<vmem>>, vector<1x16x64xf32>
    %4 = vector.shape_cast %3 : vector<1x16x64xf32> to vector<16x64xf32>
    %c0_7 = arith.constant 0 : index
    %c0_8 = arith.constant 0 : index
    %c0_9 = arith.constant 0 : index
    %5 = vector.load %arg2[%c0_7, %c0_8, %c0_9] : memref<3x64x128xf32, #tpu.memory_space<vmem>>, vector<1x64x128xf32>
    %6 = vector.shape_cast %5 : vector<1x64x128xf32> to vector<64x128xf32>
    %cst_10 = arith.constant dense<0.000000e+00> : vector<16x128xf32>
    %7 = tpu.matmul %4, %6, %cst_10 {dimension_numbers = #tpu.dot_dimension_numbers<[1], [0], [0], [1], [0, 0, 1, 1], [], []>} : vector<16x64xf32>, vector<64x128xf32>, vector<16x128xf32> -> vector<16x128xf32>
    %c0_11 = arith.constant 0 : index
    %c1 = arith.constant 1 : index
    %c0_12 = arith.constant 0 : index
    %8 = vector.load %arg1[%c0_11, %c1, %c0_12] : memref<2x18x64xf32, #tpu.memory_space<vmem>>, vector<1x16x64xf32>
    %9 = vector.shape_cast %8 : vector<1x16x64xf32> to vector<16x64xf32>
    %c1_13 = arith.constant 1 : index
    %c0_14 = arith.constant 0 : index
    %c0_15 = arith.constant 0 : index
    %10 = vector.load %arg2[%c1_13, %c0_14, %c0_15] : memref<3x64x128xf32, #tpu.memory_space<vmem>>, vector<1x64x128xf32>
    %11 = vector.shape_cast %10 : vector<1x64x128xf32> to vector<64x128xf32>
    %cst_16 = arith.constant dense<0.000000e+00> : vector<16x128xf32>
    %12 = tpu.matmul %9, %11, %cst_16 {dimension_numbers = #tpu.dot_dimension_numbers<[1], [0], [0], [1], [0, 0, 1, 1], [], []>} : vector<16x64xf32>, vector<64x128xf32>, vector<16x128xf32> -> vector<16x128xf32>
    %13 = arith.addf %7, %12 : vector<16x128xf32>
    %c0_17 = arith.constant 0 : index
    %c2 = arith.constant 2 : index
    %c0_18 = arith.constant 0 : index
    %14 = vector.load %arg1[%c0_17, %c2, %c0_18] : memref<2x18x64xf32, #tpu.memory_space<vmem>>, vector<1x16x64xf32>
    %15 = vector.shape_cast %14 : vector<1x16x64xf32> to vector<16x64xf32>
    %c2_19 = arith.constant 2 : index
    %c0_20 = arith.constant 0 : index
    %c0_21 = arith.constant 0 : index
    %16 = vector.load %arg2[%c2_19, %c0_20, %c0_21] : memref<3x64x128xf32, #tpu.memory_space<vmem>>, vector<1x64x128xf32>
    %17 = vector.shape_cast %16 : vector<1x64x128xf32> to vector<64x128xf32>
    %cst_22 = arith.constant dense<0.000000e+00> : vector<16x128xf32>
    %18 = tpu.matmul %15, %17, %cst_22 {dimension_numbers = #tpu.dot_dimension_numbers<[1], [0], [0], [1], [0, 0, 1, 1], [], []>} : vector<16x64xf32>, vector<64x128xf32>, vector<16x128xf32> -> vector<16x128xf32>
    %19 = arith.addf %13, %18 : vector<16x128xf32>
    %c0_23 = arith.constant 0 : index
    %c0_24 = arith.constant 0 : index
    %20 = vector.load %arg5[%c0_23, %c0_24] : memref<1x128xf32, #tpu.memory_space<vmem>>, vector<1x128xf32>
    %21 = vector.broadcast %20 : vector<1x128xf32> to vector<16x128xf32>
    %22 = arith.addf %19, %21 : vector<16x128xf32>
    %cst_25 = arith.constant 0.000000e+00 : f32
    %23 = vector.broadcast %cst_25 : f32 to vector<16x128xf32>
    %24 = arith.maximumf %22, %23 : vector<16x128xf32>
    %c0_26 = arith.constant 0 : index
    %c1_27 = arith.constant 1 : index
    %c0_28 = arith.constant 0 : index
    %25 = vector.load %arg9[%c0_26, %c1_27, %c0_28] : memref<2x18x128xf32, #tpu.memory_space<vmem>>, vector<1x16x128xf32>
    %26 = vector.shape_cast %25 : vector<1x16x128xf32> to vector<16x128xf32>
    %27 = vector.shape_cast %24 : vector<16x128xf32> to vector<1x16x128xf32>
    tpu.vector_store %arg9[%c0_26, %c1_27, %c0_28], %27 {strides = array<i32>} : memref<2x18x128xf32, #tpu.memory_space<vmem>>, vector<1x16x128xf32>,
    %c0_29 = arith.constant 0 : index
    %c0_30 = arith.constant 0 : index
    %c0_31 = arith.constant 0 : index
    %28 = vector.load %arg9[%c0_29, %c0_30, %c0_31] : memref<2x18x128xf32, #tpu.memory_space<vmem>>, vector<1x16x128xf32>
    %29 = vector.shape_cast %28 : vector<1x16x128xf32> to vector<16x128xf32>
    %c0_32 = arith.constant 0 : index
    %c0_33 = arith.constant 0 : index
    %c0_34 = arith.constant 0 : index
    %30 = vector.load %arg3[%c0_32, %c0_33, %c0_34] : memref<3x128x128xf32, #tpu.memory_space<vmem>>, vector<1x128x128xf32>
    %31 = vector.shape_cast %30 : vector<1x128x128xf32> to vector<128x128xf32>
    %cst_35 = arith.constant dense<0.000000e+00> : vector<16x128xf32>
    %32 = tpu.matmul %29, %31, %cst_35 {dimension_numbers = #tpu.dot_dimension_numbers<[1], [0], [0], [1], [0, 0, 1, 1], [], []>} : vector<16x128xf32>, vector<128x128xf32>, vector<16x128xf32> -> vector<16x128xf32>
    %c1_36 = arith.constant 1 : index
    %c0_37 = arith.constant 0 : index
    %c0_38 = arith.constant 0 : index
    %33 = vector.load %arg3[%c1_36, %c0_37, %c0_38] : memref<3x128x128xf32, #tpu.memory_space<vmem>>, vector<1x128x128xf32>
    %34 = vector.shape_cast %33 : vector<1x128x128xf32> to vector<128x128xf32>
    %cst_39 = arith.constant dense<0.000000e+00> : vector<16x128xf32>
    %35 = tpu.matmul %24, %34, %cst_39 {dimension_numbers = #tpu.dot_dimension_numbers<[1], [0], [0], [1], [0, 0, 1, 1], [], []>} : vector<16x128xf32>, vector<128x128xf32>, vector<16x128xf32> -> vector<16x128xf32>
    %36 = arith.addf %32, %35 : vector<16x128xf32>
    %c0_40 = arith.constant 0 : index
    %c2_41 = arith.constant 2 : index
    %c0_42 = arith.constant 0 : index
    %37 = vector.load %arg9[%c0_40, %c2_41, %c0_42] : memref<2x18x128xf32, #tpu.memory_space<vmem>>, vector<1x16x128xf32>
    %38 = vector.shape_cast %37 : vector<1x16x128xf32> to vector<16x128xf32>
    %c2_43 = arith.constant 2 : index
    %c0_44 = arith.constant 0 : index
    %c0_45 = arith.constant 0 : index
    %39 = vector.load %arg3[%c2_43, %c0_44, %c0_45] : memref<3x128x128xf32, #tpu.memory_space<vmem>>, vector<1x128x128xf32>
    %40 = vector.shape_cast %39 : vector<1x128x128xf32> to vector<128x128xf32>
    %cst_46 = arith.constant dense<0.000000e+00> : vector<16x128xf32>
    %41 = tpu.matmul %38, %40, %cst_46 {dimension_numbers = #tpu.dot_dimension_numbers<[1], [0], [0], [1], [0, 0, 1, 1], [], []>} : vector<16x128xf32>, vector<128x128xf32>, vector<16x128xf32> -> vector<16x128xf32>
    %42 = arith.addf %36, %41 : vector<16x128xf32>
    %c0_47 = arith.constant 0 : index
    %c0_48 = arith.constant 0 : index
    %43 = vector.load %arg6[%c0_47, %c0_48] : memref<1x128xf32, #tpu.memory_space<vmem>>, vector<1x128xf32>
    %44 = vector.broadcast %43 : vector<1x128xf32> to vector<16x128xf32>
    %45 = arith.addf %42, %44 : vector<16x128xf32>
    %cst_49 = arith.constant 0.000000e+00 : f32
    %46 = vector.broadcast %cst_49 : f32 to vector<16x128xf32>
    %47 = arith.maximumf %45, %46 : vector<16x128xf32>
    %c0_50 = arith.constant 0 : index
    %c1_51 = arith.constant 1 : index
    %c0_52 = arith.constant 0 : index
    %48 = vector.load %arg1[%c0_50, %c1_51, %c0_52] : memref<2x18x64xf32, #tpu.memory_space<vmem>>, vector<1x16x64xf32>
    %49 = vector.shape_cast %48 : vector<1x16x64xf32> to vector<16x64xf32>
    %c0_53 = arith.constant 0 : index
    %c0_54 = arith.constant 0 : index
    %50 = vector.load %arg4[%c0_53, %c0_54] : memref<64x128xf32, #tpu.memory_space<vmem>>, vector<64x128xf32>
    %cst_55 = arith.constant dense<0.000000e+00> : vector<16x128xf32>
    %51 = tpu.matmul %49, %50, %cst_55 {dimension_numbers = #tpu.dot_dimension_numbers<[1], [0], [0], [1], [0, 0, 1, 1], [], []>} : vector<16x64xf32>, vector<64x128xf32>, vector<16x128xf32> -> vector<16x128xf32>
    %c0_56 = arith.constant 0 : index
    %c0_57 = arith.constant 0 : index
    %52 = vector.load %arg7[%c0_56, %c0_57] : memref<1x128xf32, #tpu.memory_space<vmem>>, vector<1x128xf32>
    %53 = vector.broadcast %52 : vector<1x128xf32> to vector<16x128xf32>
    %54 = arith.addf %51, %53 : vector<16x128xf32>
    %55 = arith.addf %47, %54 : vector<16x128xf32>
    %cst_58 = arith.constant 0.000000e+00 : f32
    %56 = vector.broadcast %cst_58 : f32 to vector<16x128xf32>
    %57 = arith.maximumf %55, %56 : vector<16x128xf32>
    %c0_59 = arith.constant 0 : index
    %c0_60 = arith.constant 0 : index
    %c0_61 = arith.constant 0 : index
    %58 = vector.load %arg8[%c0_59, %c0_60, %c0_61] : memref<2x16x128xf32, #tpu.memory_space<vmem>>, vector<1x16x128xf32>
    %59 = vector.shape_cast %58 : vector<1x16x128xf32> to vector<16x128xf32>
    %60 = vector.shape_cast %57 : vector<16x128xf32> to vector<1x16x128xf32>
    tpu.vector_store %arg8[%c0_59, %c0_60, %c0_61], %60 {strides = array<i32>} : memref<2x16x128xf32, #tpu.memory_space<vmem>>, vector<1x16x128xf32>,
    %c1_62 = arith.constant 1 : index
    %c0_63 = arith.constant 0 : index
    %c0_64 = arith.constant 0 : index
    %61 = vector.load %arg1[%c1_62, %c0_63, %c0_64] : memref<2x18x64xf32, #tpu.memory_space<vmem>>, vector<1x16x64xf32>
    %62 = vector.shape_cast %61 : vector<1x16x64xf32> to vector<16x64xf32>
    %c0_65 = arith.constant 0 : index
    %c0_66 = arith.constant 0 : index
    %c0_67 = arith.constant 0 : index
    %63 = vector.load %arg2[%c0_65, %c0_66, %c0_67] : memref<3x64x128xf32, #tpu.memory_space<vmem>>, vector<1x64x128xf32>
    %64 = vector.shape_cast %63 : vector<1x64x128xf32> to vector<64x128xf32>
    %cst_68 = arith.constant dense<0.000000e+00> : vector<16x128xf32>
    %65 = tpu.matmul %62, %64, %cst_68 {dimension_numbers = #tpu.dot_dimension_numbers<[1], [0], [0], [1], [0, 0, 1, 1], [], []>} : vector<16x64xf32>, vector<64x128xf32>, vector<16x128xf32> -> vector<16x128xf32>
    %c1_69 = arith.constant 1 : index
    %c1_70 = arith.constant 1 : index
    %c0_71 = arith.constant 0 : index
    %66 = vector.load %arg1[%c1_69, %c1_70, %c0_71] : memref<2x18x64xf32, #tpu.memory_space<vmem>>, vector<1x16x64xf32>
    %67 = vector.shape_cast %66 : vector<1x16x64xf32> to vector<16x64xf32>
    %c1_72 = arith.constant 1 : index
    %c0_73 = arith.constant 0 : index
    %c0_74 = arith.constant 0 : index
    %68 = vector.load %arg2[%c1_72, %c0_73, %c0_74] : memref<3x64x128xf32, #tpu.memory_space<vmem>>, vector<1x64x128xf32>
    %69 = vector.shape_cast %68 : vector<1x64x128xf32> to vector<64x128xf32>
    %cst_75 = arith.constant dense<0.000000e+00> : vector<16x128xf32>
    %70 = tpu.matmul %67, %69, %cst_75 {dimension_numbers = #tpu.dot_dimension_numbers<[1], [0], [0], [1], [0, 0, 1, 1], [], []>} : vector<16x64xf32>, vector<64x128xf32>, vector<16x128xf32> -> vector<16x128xf32>
    %71 = arith.addf %65, %70 : vector<16x128xf32>
    %c1_76 = arith.constant 1 : index
    %c2_77 = arith.constant 2 : index
    %c0_78 = arith.constant 0 : index
    %72 = vector.load %arg1[%c1_76, %c2_77, %c0_78] : memref<2x18x64xf32, #tpu.memory_space<vmem>>, vector<1x16x64xf32>
    %73 = vector.shape_cast %72 : vector<1x16x64xf32> to vector<16x64xf32>
    %c2_79 = arith.constant 2 : index
    %c0_80 = arith.constant 0 : index
    %c0_81 = arith.constant 0 : index
    %74 = vector.load %arg2[%c2_79, %c0_80, %c0_81] : memref<3x64x128xf32, #tpu.memory_space<vmem>>, vector<1x64x128xf32>
    %75 = vector.shape_cast %74 : vector<1x64x128xf32> to vector<64x128xf32>
    %cst_82 = arith.constant dense<0.000000e+00> : vector<16x128xf32>
    %76 = tpu.matmul %73, %75, %cst_82 {dimension_numbers = #tpu.dot_dimension_numbers<[1], [0], [0], [1], [0, 0, 1, 1], [], []>} : vector<16x64xf32>, vector<64x128xf32>, vector<16x128xf32> -> vector<16x128xf32>
    %77 = arith.addf %71, %76 : vector<16x128xf32>
    %c0_83 = arith.constant 0 : index
    %c0_84 = arith.constant 0 : index
    %78 = vector.load %arg5[%c0_83, %c0_84] : memref<1x128xf32, #tpu.memory_space<vmem>>, vector<1x128xf32>
    %79 = vector.broadcast %78 : vector<1x128xf32> to vector<16x128xf32>
    %80 = arith.addf %77, %79 : vector<16x128xf32>
    %cst_85 = arith.constant 0.000000e+00 : f32
    %81 = vector.broadcast %cst_85 : f32 to vector<16x128xf32>
    %82 = arith.maximumf %80, %81 : vector<16x128xf32>
    %c1_86 = arith.constant 1 : index
    %c1_87 = arith.constant 1 : index
    %c0_88 = arith.constant 0 : index
    %83 = vector.load %arg9[%c1_86, %c1_87, %c0_88] : memref<2x18x128xf32, #tpu.memory_space<vmem>>, vector<1x16x128xf32>
    %84 = vector.shape_cast %83 : vector<1x16x128xf32> to vector<16x128xf32>
    %85 = vector.shape_cast %82 : vector<16x128xf32> to vector<1x16x128xf32>
    tpu.vector_store %arg9[%c1_86, %c1_87, %c0_88], %85 {strides = array<i32>} : memref<2x18x128xf32, #tpu.memory_space<vmem>>, vector<1x16x128xf32>,
    %c1_89 = arith.constant 1 : index
    %c0_90 = arith.constant 0 : index
    %c0_91 = arith.constant 0 : index
    %86 = vector.load %arg9[%c1_89, %c0_90, %c0_91] : memref<2x18x128xf32, #tpu.memory_space<vmem>>, vector<1x16x128xf32>
    %87 = vector.shape_cast %86 : vector<1x16x128xf32> to vector<16x128xf32>
    %c0_92 = arith.constant 0 : index
    %c0_93 = arith.constant 0 : index
    %c0_94 = arith.constant 0 : index
    %88 = vector.load %arg3[%c0_92, %c0_93, %c0_94] : memref<3x128x128xf32, #tpu.memory_space<vmem>>, vector<1x128x128xf32>
    %89 = vector.shape_cast %88 : vector<1x128x128xf32> to vector<128x128xf32>
    %cst_95 = arith.constant dense<0.000000e+00> : vector<16x128xf32>
    %90 = tpu.matmul %87, %89, %cst_95 {dimension_numbers = #tpu.dot_dimension_numbers<[1], [0], [0], [1], [0, 0, 1, 1], [], []>} : vector<16x128xf32>, vector<128x128xf32>, vector<16x128xf32> -> vector<16x128xf32>
    %c1_96 = arith.constant 1 : index
    %c0_97 = arith.constant 0 : index
    %c0_98 = arith.constant 0 : index
    %91 = vector.load %arg3[%c1_96, %c0_97, %c0_98] : memref<3x128x128xf32, #tpu.memory_space<vmem>>, vector<1x128x128xf32>
    %92 = vector.shape_cast %91 : vector<1x128x128xf32> to vector<128x128xf32>
    %cst_99 = arith.constant dense<0.000000e+00> : vector<16x128xf32>
    %93 = tpu.matmul %82, %92, %cst_99 {dimension_numbers = #tpu.dot_dimension_numbers<[1], [0], [0], [1], [0, 0, 1, 1], [], []>} : vector<16x128xf32>, vector<128x128xf32>, vector<16x128xf32> -> vector<16x128xf32>
    %94 = arith.addf %90, %93 : vector<16x128xf32>
    %c1_100 = arith.constant 1 : index
    %c2_101 = arith.constant 2 : index
    %c0_102 = arith.constant 0 : index
    %95 = vector.load %arg9[%c1_100, %c2_101, %c0_102] : memref<2x18x128xf32, #tpu.memory_space<vmem>>, vector<1x16x128xf32>
    %96 = vector.shape_cast %95 : vector<1x16x128xf32> to vector<16x128xf32>
    %c2_103 = arith.constant 2 : index
    %c0_104 = arith.constant 0 : index
    %c0_105 = arith.constant 0 : index
    %97 = vector.load %arg3[%c2_103, %c0_104, %c0_105] : memref<3x128x128xf32, #tpu.memory_space<vmem>>, vector<1x128x128xf32>
    %98 = vector.shape_cast %97 : vector<1x128x128xf32> to vector<128x128xf32>
    %cst_106 = arith.constant dense<0.000000e+00> : vector<16x128xf32>
    %99 = tpu.matmul %96, %98, %cst_106 {dimension_numbers = #tpu.dot_dimension_numbers<[1], [0], [0], [1], [0, 0, 1, 1], [], []>} : vector<16x128xf32>, vector<128x128xf32>, vector<16x128xf32> -> vector<16x128xf32>
    %100 = arith.addf %94, %99 : vector<16x128xf32>
    %c0_107 = arith.constant 0 : index
    %c0_108 = arith.constant 0 : index
    %101 = vector.load %arg6[%c0_107, %c0_108] : memref<1x128xf32, #tpu.memory_space<vmem>>, vector<1x128xf32>
    %102 = vector.broadcast %101 : vector<1x128xf32> to vector<16x128xf32>
    %103 = arith.addf %100, %102 : vector<16x128xf32>
    %cst_109 = arith.constant 0.000000e+00 : f32
    %104 = vector.broadcast %cst_109 : f32 to vector<16x128xf32>
    %105 = arith.maximumf %103, %104 : vector<16x128xf32>
    %c1_110 = arith.constant 1 : index
    %c1_111 = arith.constant 1 : index
    %c0_112 = arith.constant 0 : index
    %106 = vector.load %arg1[%c1_110, %c1_111, %c0_112] : memref<2x18x64xf32, #tpu.memory_space<vmem>>, vector<1x16x64xf32>
    %107 = vector.shape_cast %106 : vector<1x16x64xf32> to vector<16x64xf32>
    %c0_113 = arith.constant 0 : index
    %c0_114 = arith.constant 0 : index
    %108 = vector.load %arg4[%c0_113, %c0_114] : memref<64x128xf32, #tpu.memory_space<vmem>>, vector<64x128xf32>
    %cst_115 = arith.constant dense<0.000000e+00> : vector<16x128xf32>
    %109 = tpu.matmul %107, %108, %cst_115 {dimension_numbers = #tpu.dot_dimension_numbers<[1], [0], [0], [1], [0, 0, 1, 1], [], []>} : vector<16x64xf32>, vector<64x128xf32>, vector<16x128xf32> -> vector<16x128xf32>
    %c0_116 = arith.constant 0 : index
    %c0_117 = arith.constant 0 : index
    %110 = vector.load %arg7[%c0_116, %c0_117] : memref<1x128xf32, #tpu.memory_space<vmem>>, vector<1x128xf32>
    %111 = vector.broadcast %110 : vector<1x128xf32> to vector<16x128xf32>
    %112 = arith.addf %109, %111 : vector<16x128xf32>
    %113 = arith.addf %105, %112 : vector<16x128xf32>
    %cst_118 = arith.constant 0.000000e+00 : f32
    %114 = vector.broadcast %cst_118 : f32 to vector<16x128xf32>
    %115 = arith.maximumf %113, %114 : vector<16x128xf32>
    %c1_119 = arith.constant 1 : index
    %c0_120 = arith.constant 0 : index
    %c0_121 = arith.constant 0 : index
    %116 = vector.load %arg8[%c1_119, %c0_120, %c0_121] : memref<2x16x128xf32, #tpu.memory_space<vmem>>, vector<1x16x128xf32>
    %117 = vector.shape_cast %116 : vector<1x16x128xf32> to vector<16x128xf32>
    %118 = vector.shape_cast %115 : vector<16x128xf32> to vector<1x16x128xf32>
    tpu.vector_store %arg8[%c1_119, %c0_120, %c0_121], %118 {strides = array<i32>} : memref<2x16x128xf32, #tpu.memory_space<vmem>>, vector<1x16x128xf32>,
    return
  }
  func.func @transform_0(%arg0: i32) -> (i32, i32, i32) {
    %c0_i32 = arith.constant 0 : i32
    %c0_i32_0 = arith.constant 0 : i32
    %c0_i32_1 = arith.constant 0 : i32
    return %arg0, %c0_i32, %c0_i32_0 : i32, i32, i32
  }
  func.func @transform_1(%arg0: i32) -> (i32, i32, i32) {
    %c0_i32 = arith.constant 0 : i32
    %c0_i32_0 = arith.constant 0 : i32
    %c0_i32_1 = arith.constant 0 : i32
    %c0_i32_2 = arith.constant 0 : i32
    return %c0_i32, %c0_i32_0, %c0_i32_1 : i32, i32, i32
  }
  func.func @transform_2(%arg0: i32) -> (i32, i32, i32) {
    %c0_i32 = arith.constant 0 : i32
    %c0_i32_0 = arith.constant 0 : i32
    %c0_i32_1 = arith.constant 0 : i32
    %c0_i32_2 = arith.constant 0 : i32
    return %c0_i32, %c0_i32_0, %c0_i32_1 : i32, i32, i32
  }
  func.func @transform_3(%arg0: i32) -> (i32, i32) {
    %c0_i32 = arith.constant 0 : i32
    %c0_i32_0 = arith.constant 0 : i32
    %c0_i32_1 = arith.constant 0 : i32
    return %c0_i32, %c0_i32_0 : i32, i32
  }
  func.func @transform_4(%arg0: i32) -> (i32, i32) {
    %c0_i32 = arith.constant 0 : i32
    %c0_i32_0 = arith.constant 0 : i32
    %c0_i32_1 = arith.constant 0 : i32
    return %c0_i32, %c0_i32_0 : i32, i32
  }
  func.func @transform_5(%arg0: i32) -> (i32, i32) {
    %c0_i32 = arith.constant 0 : i32
    %c0_i32_0 = arith.constant 0 : i32
    %c0_i32_1 = arith.constant 0 : i32
    return %c0_i32, %c0_i32_0 : i32, i32
  }
  func.func @transform_6(%arg0: i32) -> (i32, i32) {
    %c0_i32 = arith.constant 0 : i32
    %c0_i32_0 = arith.constant 0 : i32
    %c0_i32_1 = arith.constant 0 : i32
    return %c0_i32, %c0_i32_0 : i32, i32
  }
  func.func @transform_7(%arg0: i32) -> (i32, i32, i32) {
    %c0_i32 = arith.constant 0 : i32
    %c0_i32_0 = arith.constant 0 : i32
    %c0_i32_1 = arith.constant 0 : i32
    return %arg0, %c0_i32, %c0_i32_0 : i32, i32, i32
  }
}

</mosaic_0001>

<bundles_post_ra>
// kernel: tpu_custom_call.1
= control target key start
LH: loop header
LB: loop body
LE: loop exit
PB: predicated region body
PF: predicated region fallthrough
CT: control target
= control target key end

     0   :  { %12 = vsyncpa [#allocation4], 0  ;;  %s2764_s0 = inlined_call_operand.vmem [shape: f32[2,18,64], index: 0, kind: input, shape index: {}]   ;;  %s2765_s1 = inlined_call_operand.hbm [shape: f32[3,64,128], index: 1, kind: input, shape index: {}]   ;;  %s2766_s2 = inlined_call_operand.hbm [shape: f32[3,128,128], index: 2, kind: input, shape index: {}]   ;;  %s2767_s3 = inlined_call_operand.vmem [shape: f32[64,128], index: 3, kind: input, shape index: {}]   ;;  %s2768_s4 = inlined_call_operand.vmem [shape: f32[1,128], index: 4, kind: input, shape index: {}]   ;;  %s2769_s5 = inlined_call_operand.vmem [shape: f32[1,128], index: 5, kind: input, shape index: {}]   ;;  %s2770_s6 = inlined_call_operand.vmem [shape: f32[1,128], index: 6, kind: input, shape index: {}]   ;;  %s2771_s7 = inlined_call_operand.hbm [shape: f32[2,16,128], index: 7, kind: output, shape index: {}]  }
   0x1   :  { %13 = vsyncpa [#allocation7], 0 }
   0x2   :  { %14 = vsyncpa [#allocation5], 0  ;;  %s2101_s24 = smov [#allocation3]  }
   0x3   :  { %s22_s25 = sshll.u32 %s2101_s24, 4  ;;  %s23_s25 = int_to_ptr.vmem [resolvable:$true] %s22_s25 }
   0x4   :  { %s2043_s26 = scalar_lea.vmem %s23_s25, 3072  ;;  %p2048_p1 = scmp.lt.s32.totalorder %s23_s25, %s23_s25 }
   0x5   :  { %p2044_p0 = scmp.ne.s32.totalorder %s23_s25, %s2043_s26  ;;  %p2049_p2 = scmp.lt.s32.totalorder %s2043_s26, %s2043_s26 }
   0x7   :  { %p2050_p3 = por %p2049_p2, %p2048_p1 }
   0x9   :  { %p2051_p4 = pnand %p2050_p3, %p2044_p0 }
   0xb   :  { %2054 = shalt.err (!%p2051_p4)
}
   0xc   :  { %s2102_s27 = smov 128   ;;  %s2103_s28 = smov 8  }
   0xd   :  { %28 = dma.hbm_to_vmem [thread:$0]  %s2765_s1, 3072, %s23_s25, [#allocation4], %s2102_s27, %s2102_s27, %s2103_s28  }
   0xe   :  { %s2104_s8 = smov [#allocation6]  }
   0xf   :  { %s34_s9 = sshll.u32 %s2104_s8, 4  ;;  %s35_s9 = int_to_ptr.vmem [resolvable:$true] %s34_s9 }
  0x10   :  { %s2063_s10 = scalar_lea.vmem %s35_s9, 6144  ;;  %p2068_p6 = scmp.lt.s32.totalorder %s35_s9, %s35_s9 }
  0x11   :  { %p2064_p5 = scmp.ne.s32.totalorder %s35_s9, %s2063_s10  ;;  %p2069_p7 = scmp.lt.s32.totalorder %s2063_s10, %s2063_s10 }
  0x13   :  { %p2070_p8 = por %p2069_p7, %p2068_p6 }
  0x15   :  { %p2071_p9 = pnand %p2070_p8, %p2064_p5 }
  0x17   :  { %2074 = shalt.err (!%p2071_p9)
}
  0x18   :  { %40 = dma.hbm_to_vmem [thread:$0]  %s2766_s2, 6144, %s35_s9, [#allocation7], %s2102_s27, %s2102_s27, %s2103_s28  }
  0x19   :  { %2095 = dma.done.wait [#allocation4], 3072  }
  0x1a   :  { %2096 = vsyncadd [#allocation4], 4294964224 }
  0x1b   :  { %2097 = dma.done.wait [#allocation7], 6144  }
  0x1c   :  { %2098 = vsyncadd [#allocation7], 4294961152  ;;  %v2159_v0 = vld [vmem:[#allocation3 + $0x78] sm:$0xff]  ;;  %v2163_v2 = vld [vmem:[#allocation3 + $0x70] sm:$0xff]  ;;  %vm80_vm0 = vcmask 523264   ;;  %v2105_v60 = vmov 0.0  }
  0x1d   :  { %v2161_v1 = vld [vmem:[#allocation3 + $0x38] sm:$0xff]  ;;  %1667 = vmatprep.subr.mxu0 %v2159_v0  ;;  %v2167_v3 = vld [vmem:[#allocation3 + $0x30] sm:$0xff]  ;;  %v2171_v4 = vld [vmem:[#allocation3 + $0x68] sm:$0xff]  ;;  %55 = vst [vmem:[#allocation2] sm:$0x1] %v2105_v60 }
  0x1e   :  { %1686 = vmatprep.subr.mxu1 %v2161_v1  ;;  %1668 = vmatpush3.msra.mxu0 %v2159_v0  ;;  %v2173_v5 = vld [vmem:[#allocation3 + $0x28] sm:$0xff]  ;;  %v2179_v6 = vld [vmem:[#allocation3 + $0x60] sm:$0xff]  ;;  %v2187_v8 = vld [vmem:[#allocation3 + $0x58] sm:$0xff]  ;;  %56 = vst [vmem:[#allocation2 + $0x18] sm:$0x1] %v2105_v60 }
  0x1f   :  { %1687 = vmatpush3.msra.mxu1 %v2161_v1  ;;  %1669 = vmatprep.subr.mxu0 %v2163_v2  ;;  %v2181_v7 = vld [vmem:[#allocation3 + $0x20] sm:$0xff]  ;;  %v2189_v9 = vld [vmem:[#allocation3 + $0x18] sm:$0xff]  ;;  %v2195_v10 = vld [vmem:[#allocation3 + $0x50] sm:$0xff]  ;;  %57 = vst [vmem:[#allocation2 + $0x11] sm:$0x1] %v2105_v60 }
  0x20   :  { %1688 = vmatprep.subr.mxu1 %v2167_v3  ;;  %1670 = vmatpush3.msra.mxu0 %v2163_v2  ;;  %v2197_v11 = vld [vmem:[#allocation3 + $0x10] sm:$0xff]  ;;  %v2203_v12 = vld [vmem:[#allocation3 + $0x48] sm:$0xff]  ;;  %v2211_v14 = vld [vmem:[#allocation3 + $0x40] sm:$0xff]  ;;  %58 = vst [vmem:[#allocation2 + $0x29] sm:$0x1] %v2105_v60 }
  0x21   :  { %1689 = vmatpush3.msra.mxu1 %v2167_v3  ;;  %1671 = vmatprep.subr.mxu0 %v2171_v4  ;;  %v2205_v13 = vld [vmem:[#allocation3 + $0x8] sm:$0xff]  ;;  %v2213_v15 = vld [vmem:[#allocation3] sm:$0xff]  ;;  %v2220_v16 = vld [vmem:[%s2764_s0 + $0x1] sm:$0xff] }
  0x22   :  { %1690 = vmatprep.subr.mxu1 %v2173_v5  ;;  %1672 = vmatpush3.msra.mxu0 %v2171_v4  ;;  %v59_v17 = vld [vmem:[%s2764_s0] sm:$0xff]  ;;  %v2232_v18 = vld [vmem:[%s2764_s0 + $0x9] sm:$0xff]  ;;  %v2259_v25 = vld [vmem:[#allocation3 + $0xa8] sm:$0xff] }
  0x23   :  { %1691 = vmatpush3.msra.mxu1 %v2173_v5  ;;  %1673 = vmatprep.subr.mxu0 %v2179_v6  ;;  %v60_v19 = vld [vmem:[%s2764_s0 + $0x8] sm:$0xff]  ;;  %v2252_v23 = vld [vmem:[#allocation3 + $0xb0] sm:$0xff]  ;;  %v2264_v26 = vld [vmem:[#allocation6 + $0xe8] sm:$0xff] }
  0x24   :  { %1692 = vmatprep.subr.mxu1 %v2181_v7  ;;  %1674 = vmatpush3.msra.mxu0 %v2179_v6  ;;  %v2240_v20 = vld [vmem:[#allocation3 + $0xb8] sm:$0xff]  ;;  %v2256_v24 = vld [vmem:[#allocation6 + $0xf0] sm:$0xff]  ;;  %v2267_v27 = vld [vmem:[#allocation3 + $0xa0] sm:$0xff] }
  0x25   :  { %1693 = vmatpush3.msra.mxu1 %v2181_v7  ;;  %1675 = vmatprep.subr.mxu0 %v2187_v8  ;;  %v243_v21 = vld [vmem:[%s2764_s0 + $0x2] sm:$0xff]  ;;  %v2272_v28 = vld [vmem:[#allocation6 + $0xe0] sm:$0xff]  ;;  %v2287_v31 = vld [vmem:[#allocation3 + $0x88] sm:$0xff] }
  0x26   :  { %1694 = vmatprep.subr.mxu1 %v2189_v9  ;;  %1676 = vmatpush3.msra.mxu0 %v2187_v8  ;;  %v2247_v22 = vld [vmem:[#allocation6 + $0xf8] sm:$0xff]  ;;  %v2281_v30 = vld [vmem:[#allocation3 + $0x90] sm:$0xff]  ;;  %v2291_v32 = vld [vmem:[#allocation3 + $0x80] sm:$0xff] }
  0x27   :  { %1695 = vmatpush3.msra.mxu1 %v2189_v9  ;;  %1677 = vmatprep.subr.mxu0 %v2195_v10  ;;  %v2275_v29 = vld [vmem:[#allocation3 + $0x98] sm:$0xff]  ;;  %v2309_v36 = vld [vmem:[#allocation6 + $0xd0] sm:$0xff]  ;;  %v2313_v38 = vld [vmem:[#allocation6 + $0xc8] sm:$0xff] }
  0x28   :  { %1696 = vmatprep.subr.mxu1 %v2197_v11  ;;  %1678 = vmatpush3.msra.mxu0 %v2195_v10  ;;  %v244_v33 = vld [vmem:[%s2764_s0 + $0xa] sm:$0xff]  ;;  %v2311_v37 = vld [vmem:[#allocation6 + $0x70] sm:$0xff]  ;;  %v2317_v39 = vld [vmem:[#allocation6 + $0x68] sm:$0xff] }
  0x29   :  { %1697 = vmatpush3.msra.mxu1 %v2197_v11  ;;  %1679 = vmatprep.subr.mxu0 %v2203_v12  ;;  %v2301_v34 = vld [vmem:[#allocation6 + $0xd8] sm:$0xff]  ;;  %v2321_v40 = vld [vmem:[#allocation6 + $0xc0] sm:$0xff]  ;;  %v2337_v44 = vld [vmem:[#allocation6 + $0xb0] sm:$0xff] }
  0x2a   :  { %1698 = vmatprep.subr.mxu1 %v2205_v13  ;;  %1680 = vmatpush3.msra.mxu0 %v2203_v12  ;;  %v2303_v35 = vld [vmem:[#allocation6 + $0x78] sm:$0xff]  ;;  %v2323_v41 = vld [vmem:[#allocation6 + $0x60] sm:$0xff]  ;;  %v2339_v45 = vld [vmem:[#allocation6 + $0x50] sm:$0xff] }
  0x2b   :  { %1699 = vmatpush3.msra.mxu1 %v2205_v13  ;;  %1681 = vmatprep.subr.mxu0 %v2211_v14  ;;  %v2329_v42 = vld [vmem:[#allocation6 + $0xb8] sm:$0xff]  ;;  %v2345_v46 = vld [vmem:[#allocation6 + $0xa8] sm:$0xff]  ;;  %v2353_v48 = vld [vmem:[#allocation6 + $0xa0] sm:$0xff] }
  0x2c   :  { %1700 = vmatprep.subr.mxu1 %v2213_v15  ;;  %1682 = vmatpush3.msra.mxu0 %v2211_v14  ;;  %v2331_v43 = vld [vmem:[#allocation6 + $0x58] sm:$0xff]  ;;  %v2347_v47 = vld [vmem:[#allocation6 + $0x48] sm:$0xff]  ;;  %v2355_v49 = vld [vmem:[#allocation6 + $0x40] sm:$0xff] }
  0x2d   :  { %1683 = vmatprep.mubr.msk.f32.mxu0 %vm80_vm0, %v2220_v16  ;;  %1701 = vmatpush3.msra.mxu1 %v2213_v15  ;;  %v2365_v50 = vld [vmem:[#allocation6 + $0x98] sm:$0xff]  ;;  %v2373_v52 = vld [vmem:[#allocation6 + $0x90] sm:$0xff]  ;;  %v2381_v54 = vld [vmem:[#allocation6 + $0x88] sm:$0xff] }
  0x2e   :  { %1702 = vmatprep.mubr.msk.f32.mxu1 %vm80_vm0, %v59_v17  ;;  %1684 = vmatmul.mubr.msk.f32.vlgmr.msra.gmra.mxu0 %vm80_vm0, %v2232_v18  ;;  %v2367_v51 = vld [vmem:[#allocation6 + $0x38] sm:$0xff]  ;;  %2809 = vst [vmem:[#allocation13_spill] sm:$0xff] %v2373_v52  ;;  %v2375_v53 = vld [vmem:[#allocation6 + $0x30] sm:$0xff]  ;;  %2811 = vst [vmem:[#allocation15_spill] sm:$0xff] %v2381_v54 }
  0x2f   :  { %1703 = vmatmul.mubr.msk.f32.vlgmr.msra.gmra.mxu1 %vm80_vm0, %v60_v19  ;;  %1705 = vmatprep.subr.mxu0 %v2240_v20  ;;  %2808 = vst [vmem:[#allocation12_spill] sm:$0xff] %v2367_v51  ;;  %2810 = vst [vmem:[#allocation14_spill] sm:$0xff] %v2375_v53  ;;  %v2383_v55 = vld [vmem:[#allocation6 + $0x28] sm:$0xff]  ;;  %v2389_v56 = vld [vmem:[#allocation6 + $0x80] sm:$0xff] }
  0x30   :  { %1721 = vmatprep.mubr.msk.f32.mxu0 %vm80_vm0, %v243_v21  ;;  %1706 = vmatpush3.msra.mxu0 %v2240_v20  ;;  %2812 = vst [vmem:[#allocation16_spill] sm:$0xff] %v2383_v55  ;;  %2813 = vst [vmem:[#allocation17_spill] sm:$0xff] %v2389_v56  ;;  %v2391_v57 = vld [vmem:[#allocation6 + $0x20] sm:$0xff]  ;;  %v2397_v58 = vld [vmem:[#allocation6 + $0x18] sm:$0xff] }
  0x31   :  { %1724 = vmatprep.subr.mxu1 %v2247_v22  ;;  %1707 = vmatprep.subr.mxu0 %v2252_v23  ;;  %2814 = vst [vmem:[#allocation18_spill] sm:$0xff] %v2391_v57  ;;  %2815 = vst [vmem:[#allocation19_spill] sm:$0xff] %v2397_v58  ;;  %v2399_v59 = vld [vmem:[#allocation6 + $0x178] sm:$0xff]  ;;  %v2404_v61 = vld [vmem:[#allocation6 + $0x10] sm:$0xff] }
  0x32   :  { %1725 = vmatpush3.msra.mxu1 %v2247_v22  ;;  %1708 = vmatpush3.msra.mxu0 %v2252_v23  ;;  %2816 = vst [vmem:[#allocation20_spill] sm:$0xff] %v2404_v61  ;;  %v2408_v62 = vld [vmem:[#allocation6 + $0x8] sm:$0xff]  ;;  %v2412_v63 = vld [vmem:[#allocation6] sm:$0xff] }
  0x33   :  { %1726 = vmatprep.subr.mxu1 %v2256_v24  ;;  %1709 = vmatprep.subr.mxu0 %v2259_v25  ;;  %2817 = vst [vmem:[#allocation21_spill] sm:$0xff] %v2408_v62  ;;  %2818 = vst [vmem:[#allocation22_spill] sm:$0xff] %v2412_v63  ;;  %v2419_v17 = vld [vmem:[%s2767_s3 + $0x38] sm:$0xff] }
  0x34   :  { %1727 = vmatpush3.msra.mxu1 %v2256_v24  ;;  %1710 = vmatpush3.msra.mxu0 %v2259_v25 }
  0x35   :  { %1728 = vmatprep.subr.mxu1 %v2264_v26  ;;  %1711 = vmatprep.subr.mxu0 %v2267_v27 }
  0x36   :  { %1729 = vmatpush3.msra.mxu1 %v2264_v26  ;;  %1712 = vmatpush3.msra.mxu0 %v2267_v27 }
  0x37   :  { %1730 = vmatprep.subr.mxu1 %v2272_v28  ;;  %1713 = vmatprep.subr.mxu0 %v2275_v29 }
  0x38   :  { %1731 = vmatpush3.msra.mxu1 %v2272_v28  ;;  %1714 = vmatpush3.msra.mxu0 %v2275_v29 }
  0x39   :  { %1715 = vmatprep.subr.mxu0 %v2281_v30  ;;  %1732 = vmatprep.subr.mxu1 %v2301_v34 }
  0x3a   :  { %1716 = vmatpush3.msra.mxu0 %v2281_v30  ;;  %1733 = vmatpush3.msra.mxu1 %v2301_v34 }
  0x3b   :  { %1717 = vmatprep.subr.mxu0 %v2287_v31  ;;  %1734 = vmatprep.subr.mxu1 %v2309_v36 }
  0x3c   :  { %1718 = vmatpush3.msra.mxu0 %v2287_v31  ;;  %1735 = vmatpush3.msra.mxu1 %v2309_v36 }
  0x3d   :  { %1719 = vmatprep.subr.mxu0 %v2291_v32  ;;  %1736 = vmatprep.subr.mxu1 %v2313_v38 }
  0x3e   :  { %1720 = vmatpush3.msra.mxu0 %v2291_v32  ;;  %1737 = vmatpush3.msra.mxu1 %v2313_v38 }
  0x3f   :  { %1722 = vmatmul.mubr.msk.f32.vlgmr.msra.gmra.mxu0 %vm80_vm0, %v244_v33  ;;  %1759 = vmatprep.subr.mxu0 %v2303_v35 }
  0x40   :  { %1760 = vmatpush3.msra.mxu0 %v2303_v35  ;;  %1738 = vmatprep.subr.mxu1 %v2321_v40 }
  0x41   :  { %1761 = vmatprep.subr.mxu0 %v2311_v37  ;;  %1739 = vmatpush3.msra.mxu1 %v2321_v40 }
  0x42   :  { %1762 = vmatpush3.msra.mxu0 %v2311_v37  ;;  %1740 = vmatprep.subr.mxu1 %v2329_v42 }
  0x43   :  { %1763 = vmatprep.subr.mxu0 %v2317_v39  ;;  %1741 = vmatpush3.msra.mxu1 %v2329_v42 }
  0x44   :  { %1764 = vmatpush3.msra.mxu0 %v2317_v39  ;;  %1742 = vmatprep.subr.mxu1 %v2337_v44 }
  0x45   :  { %1765 = vmatprep.subr.mxu0 %v2323_v41  ;;  %1743 = vmatpush3.msra.mxu1 %v2337_v44 }
  0x46   :  { %1766 = vmatpush3.msra.mxu0 %v2323_v41  ;;  %1744 = vmatprep.subr.mxu1 %v2345_v46 }
  0x47   :  { %1767 = vmatprep.subr.mxu0 %v2331_v43  ;;  %1745 = vmatpush3.msra.mxu1 %v2345_v46 }
  0x48   :  { %1768 = vmatpush3.msra.mxu0 %v2331_v43  ;;  %1746 = vmatprep.subr.mxu1 %v2353_v48 }
  0x49   :  { %1769 = vmatprep.subr.mxu0 %v2339_v45  ;;  %1747 = vmatpush3.msra.mxu1 %v2353_v48 }
  0x4a   :  { %1770 = vmatpush3.msra.mxu0 %v2339_v45  ;;  %1748 = vmatprep.subr.mxu1 %v2365_v50 }
  0x4b   :  { %1771 = vmatprep.subr.mxu0 %v2347_v47  ;;  %1749 = vmatpush3.msra.mxu1 %v2365_v50 }
  0x4c   :  { %1772 = vmatpush3.msra.mxu0 %v2347_v47  ;;  %1750 = vmatprep.subr.mxu1 %v2373_v52 }
  0x4d   :  { %1773 = vmatprep.subr.mxu0 %v2355_v49  ;;  %1751 = vmatpush3.msra.mxu1 %v2373_v52 }
  0x4e   :  { %1774 = vmatpush3.msra.mxu0 %v2355_v49  ;;  %1752 = vmatprep.subr.mxu1 %v2381_v54 }
  0x4f   :  { %1775 = vmatprep.subr.mxu0 %v2367_v51  ;;  %1753 = vmatpush3.msra.mxu1 %v2381_v54 }
  0x50   :  { %1776 = vmatpush3.msra.mxu0 %v2367_v51  ;;  %1754 = vmatprep.subr.mxu1 %v2389_v56 }
  0x51   :  { %1777 = vmatprep.subr.mxu0 %v2375_v53  ;;  %1755 = vmatpush3.msra.mxu1 %v2389_v56 }
  0x52   :  { %1778 = vmatpush3.msra.mxu0 %v2375_v53  ;;  %1794 = vmatprep.subr.mxu1 %v2399_v59 }
  0x53   :  { %1779 = vmatprep.subr.mxu0 %v2383_v55 }
  0x54   :  { %1780 = vmatpush3.msra.mxu0 %v2383_v55 }
  0x55   :  { %1781 = vmatprep.subr.mxu0 %v2391_v57 }
  0x56   :  { %1782 = vmatpush3.msra.mxu0 %v2391_v57 }
  0x57   :  { %1783 = vmatprep.subr.mxu0 %v2397_v58 }
  0x58   :  { %1784 = vmatpush3.msra.mxu0 %v2397_v58 }
  0x59   :  { %1785 = vmatprep.subr.mxu0 %v2404_v61 }
  0x5a   :  { %1786 = vmatpush3.msra.mxu0 %v2404_v61 }
  0x5b   :  { %1787 = vmatprep.subr.mxu0 %v2408_v62 }
  0x5c   :  { %1788 = vmatpush3.msra.mxu0 %v2408_v62  ;;  %v2425_v62 = vld [vmem:[%s2768_s4] ss:$0 sm:$0xff] }
  0x5d   :  { %1789 = vmatprep.subr.mxu0 %v2412_v63 }
  0x5e   :  { %1790 = vmatpush3.msra.mxu0 %v2412_v63 }
  0x5f   :  { %1829 = vmatprep.subr.mxu0 %v2419_v17 }
  0xee   :  { %v1685_v19 = vpop.f32.mrf.mxu0 }
  0xef   :  { %v1704_v21 = vpop.f32.mrf.mxu1 }
  0xf0   :  { %v153_v33 = vpop.f32.mrf.mxu0  ;;  %v240_v61 = vadd.f32 %v1704_v21, %v1685_v19  ;;  %v2429_v19 = vld [vmem:[#allocation6 + $0x170] sm:$0xff]  ;;  %v2432_v21 = vld [vmem:[#allocation6 + $0x168] sm:$0xff] }
  0xf1   :  { %v234_v60 = vpop.f32.mrf.mxu1 }
  0xf2   :  { %v235_v57 = vadd.f32 %v234_v60, %v153_v33  ;;  %v2471_v33 = vld [vmem:[%s2767_s3 + $0x20] sm:$0xff]  ;;  %v2475_v60 = vld [vmem:[#allocation6 + $0x138] sm:$0xff] }
  0xf3   :  { %2821 = vst [vmem:[#allocation25_spill] sm:$0xff] %v2471_v33 }
  0xff   :  { %v1723_v58 = vpop.f32.mrf.mxu0 }
 0x100   :  { %v336_v63 = vadd.f32 %v1723_v58, %v240_v61  ;;  %v2436_v58 = vld [vmem:[#allocation6 + $0x160] sm:$0xff]  ;;  %v2460_v61 = vld [vmem:[%s2767_s3 + $0x28] sm:$0xff] }
 0x101   :  { %v326_v56 = vpop.f32.mrf.mxu0  ;;  %2819 = vst [vmem:[#allocation23_spill] sm:$0xff] %v2460_v61 }
 0x102   :  { %v345_v55 = vadd.f32 %v2425_v62, %v336_v63  ;;  %v335_v54 = vadd.f32 %v326_v56, %v235_v57  ;;  %v2450_v56 = vld [vmem:[%s2767_s3 + $0x30] sm:$0xff]  ;;  %v2453_v57 = vld [vmem:[#allocation6 + $0x148] sm:$0xff] }
 0x103   :  { %v2464_v63 = vld [vmem:[#allocation6 + $0x140] sm:$0xff] }
 0x104   :  { %v347_v53 = vmax.f32 %v345_v55, 0.0  ;;  %v344_v52 = vadd.f32 %v2425_v62, %v335_v54  ;;  %v2444_v55 = vld [vmem:[#allocation6 + $0x150] sm:$0xff]  ;;  %2820 = vst [vmem:[#allocation24_spill] sm:$0xff] %v2464_v63 }
 0x106   :  { %349 = vst [vmem:[#allocation2 + $0x9] sm:$0xff] %v347_v53  ;;  %v346_v51 = vmax.f32 %v344_v52, 0.0  ;;  %v2440_v52 = vld [vmem:[#allocation6 + $0x158] sm:$0xff] }
 0x108   :  { %348 = vst [vmem:[#allocation2 + $0x1] sm:$0xff] %v346_v51  ;;  %1756 = vmatprep.mubr.f32.mxu1 %v346_v51 }
 0x109   :  { %1757 = vmatmul.mubr.f32.vlgmr.msra.gmra.mxu1 %v347_v53 }
 0x10a   :  { %1795 = vmatpush3.msra.mxu1 %v2399_v59 }
 0x10b   :  { %1796 = vmatprep.subr.mxu1 %v2429_v19 }
 0x10c   :  { %1797 = vmatpush3.msra.mxu1 %v2429_v19 }
 0x10d   :  { %1798 = vmatprep.subr.mxu1 %v2432_v21 }
 0x10e   :  { %1799 = vmatpush3.msra.mxu1 %v2432_v21 }
 0x10f   :  { %1800 = vmatprep.subr.mxu1 %v2436_v58  ;;  %v350_v51 = vld [vmem:[#allocation2] sm:$0xff]  ;;  %v351_v54 = vld [vmem:[#allocation2 + $0x8] sm:$0xff] }
 0x110   :  { %v535_v53 = vld [vmem:[#allocation2 + $0x2] sm:$0xff]  ;;  %1801 = vmatpush3.msra.mxu1 %v2436_v58  ;;  %1791 = vmatprep.mubr.f32.mxu0 %v350_v51  ;;  %v2482_v51 = vld [vmem:[%s2767_s3 + $0x18] sm:$0xff] }
 0x111   :  { %1802 = vmatprep.subr.mxu1 %v2440_v52  ;;  %1826 = vmatprep.mubr.f32.mxu1 %v535_v53  ;;  %2822 = vst [vmem:[#allocation26_spill] sm:$0xff] %v2482_v51  ;;  %v2486_v53 = vld [vmem:[#allocation6 + $0x130] sm:$0xff] }
 0x112   :  { %1792 = vmatmul.mubr.f32.vlgmr.msra.gmra.mxu0 %v351_v54  ;;  %1803 = vmatpush3.msra.mxu1 %v2440_v52  ;;  %2823 = vst [vmem:[#allocation27_spill] sm:$0xff] %v2486_v53  ;;  %v2493_v54 = vld [vmem:[%s2767_s3 + $0x10] sm:$0xff] }
 0x113   :  { %1830 = vmatpush3.msra.mxu0 %v2419_v17  ;;  %1804 = vmatprep.subr.mxu1 %v2444_v55  ;;  %2824 = vst [vmem:[#allocation28_spill] sm:$0xff] %v2493_v54 }
 0x114   :  { %1831 = vmatprep.subr.mxu0 %v2450_v56  ;;  %1805 = vmatpush3.msra.mxu1 %v2444_v55 }
 0x115   :  { %1832 = vmatpush3.msra.mxu0 %v2450_v56  ;;  %1806 = vmatprep.subr.mxu1 %v2453_v57 }
 0x116   :  { %1833 = vmatprep.subr.mxu0 %v2460_v61  ;;  %1807 = vmatpush3.msra.mxu1 %v2453_v57 }
 0x117   :  { %1834 = vmatpush3.msra.mxu0 %v2460_v61  ;;  %1808 = vmatprep.subr.mxu1 %v2464_v63  ;;  %v2497_v61 = vld [vmem:[#allocation6 + $0x128] sm:$0xff] }
 0x118   :  { %1835 = vmatprep.subr.mxu0 %v2471_v33  ;;  %1809 = vmatpush3.msra.mxu1 %v2464_v63  ;;  %v2508_v63 = vld [vmem:[#allocation6 + $0x120] sm:$0xff] }
 0x119   :  { %1836 = vmatpush3.msra.mxu0 %v2471_v33  ;;  %1810 = vmatprep.subr.mxu1 %v2475_v60  ;;  %v2504_v33 = vld [vmem:[%s2767_s3 + $0x8] sm:$0xff] }
 0x11a   :  { %1837 = vmatprep.subr.mxu0 %v2482_v51  ;;  %1811 = vmatpush3.msra.mxu1 %v2475_v60  ;;  %2825 = vst [vmem:[#allocation29_spill] sm:$0xff] %v2504_v33 }
 0x11b   :  { %1838 = vmatpush3.msra.mxu0 %v2482_v51  ;;  %1812 = vmatprep.subr.mxu1 %v2486_v53  ;;  %v2515_v51 = vld [vmem:[%s2767_s3] sm:$0xff] }
 0x11c   :  { %1839 = vmatprep.subr.mxu0 %v2493_v54  ;;  %1813 = vmatpush3.msra.mxu1 %v2486_v53  ;;  %v2521_v53 = vld [vmem:[#allocation6 + $0x118] sm:$0xff] }
 0x11d   :  { %1840 = vmatpush3.msra.mxu0 %v2493_v54  ;;  %1814 = vmatprep.subr.mxu1 %v2497_v61  ;;  %v2528_v54 = vld [vmem:[#allocation6 + $0x110] sm:$0xff] }
 0x11e   :  { %1841 = vmatprep.subr.mxu0 %v2504_v33  ;;  %1815 = vmatpush3.msra.mxu1 %v2497_v61 }
 0x11f   :  { %1842 = vmatpush3.msra.mxu0 %v2504_v33  ;;  %1816 = vmatprep.subr.mxu1 %v2508_v63  ;;  %v2535_v33 = vld [vmem:[#allocation6 + $0x108] sm:$0xff] }
 0x120   :  { %1843 = vmatprep.subr.mxu0 %v2515_v51  ;;  %1817 = vmatpush3.msra.mxu1 %v2508_v63 }
 0x121   :  { %1844 = vmatpush3.msra.mxu0 %v2515_v51  ;;  %1845 = vmatprep.mubr.msk.f32.mxu0 %vm80_vm0, %v2220_v16  ;;  %v2541_v16 = vld [vmem:[#allocation6 + $0x100] sm:$0xff] }
 0x122   :  { %1818 = vmatprep.subr.mxu1 %v2521_v53  ;;  %1846 = vmatmul.mubr.msk.f32.vlgmr.msra.gmra.mxu0 %vm80_vm0, %v2232_v18  ;;  %v2835_v18 = vld [vmem:[#allocation21_spill] sm:$0xff] }
 0x123   :  { %1848 = vmatprep.subr.mxu0 %v2159_v0  ;;  %1819 = vmatpush3.msra.mxu1 %v2521_v53 }
 0x124   :  { %1849 = vmatpush3.msra.mxu0 %v2159_v0  ;;  %1820 = vmatprep.subr.mxu1 %v2528_v54  ;;  %v536_v0 = vld [vmem:[#allocation2 + $0xa] sm:$0xff] }
 0x125   :  { %1850 = vmatprep.subr.mxu0 %v2163_v2  ;;  %1821 = vmatpush3.msra.mxu1 %v2528_v54 }
 0x126   :  { %1851 = vmatpush3.msra.mxu0 %v2163_v2  ;;  %1822 = vmatprep.subr.mxu1 %v2535_v33  ;;  %v2565_v2 = vld [vmem:[%s2764_s0 + $0x19] sm:$0xff] }
 0x127   :  { %1852 = vmatprep.subr.mxu0 %v2171_v4  ;;  %1823 = vmatpush3.msra.mxu1 %v2535_v33 }
 0x128   :  { %1853 = vmatpush3.msra.mxu0 %v2171_v4  ;;  %1824 = vmatprep.subr.mxu1 %v2541_v16  ;;  %v1461_v4 = vld [vmem:[%s2764_s0 + $0x20] sm:$0xff] }
 0x129   :  { %1854 = vmatprep.subr.mxu0 %v2179_v6  ;;  %1825 = vmatpush3.msra.mxu1 %v2541_v16 }
 0x12a   :  { %1855 = vmatpush3.msra.mxu0 %v2179_v6  ;;  %1827 = vmatmul.mubr.f32.vlgmr.msra.gmra.mxu1 %v536_v0  ;;  %v1469_v6 = vld [vmem:[%s2764_s0 + $0x22] sm:$0xff] }
 0x12b   :  { %1856 = vmatprep.subr.mxu0 %v2187_v8  ;;  %1867 = vmatprep.subr.mxu1 %v2161_v1 }
 0x12c   :  { %1857 = vmatpush3.msra.mxu0 %v2187_v8  ;;  %1868 = vmatpush3.msra.mxu1 %v2161_v1  ;;  %v2572_v1 = vld [vmem:[%s2764_s0 + $0x21] sm:$0xff]  ;;  %v2827_v8 = vld [vmem:[#allocation13_spill] sm:$0xff] }
 0x12d   :  { %1858 = vmatprep.subr.mxu0 %v2195_v10  ;;  %1869 = vmatprep.subr.mxu1 %v2167_v3 }
 0x12e   :  { %1859 = vmatpush3.msra.mxu0 %v2195_v10  ;;  %1870 = vmatpush3.msra.mxu1 %v2167_v3  ;;  %v1460_v3 = vld [vmem:[%s2764_s0 + $0x18] sm:$0xff]  ;;  %v2829_v10 = vld [vmem:[#allocation15_spill] sm:$0xff] }
 0x12f   :  { %1860 = vmatprep.subr.mxu0 %v2203_v12  ;;  %1871 = vmatprep.subr.mxu1 %v2173_v5 }
 0x130   :  { %1861 = vmatpush3.msra.mxu0 %v2203_v12  ;;  %1872 = vmatpush3.msra.mxu1 %v2173_v5  ;;  %v1468_v5 = vld [vmem:[%s2764_s0 + $0x1a] sm:$0xff] }
 0x131   :  { %1862 = vmatprep.subr.mxu0 %v2211_v14  ;;  %1873 = vmatprep.subr.mxu1 %v2181_v7  ;;  %v2831_v12 = vld [vmem:[#allocation17_spill] sm:$0xff] }
 0x132   :  { %1863 = vmatpush3.msra.mxu0 %v2211_v14  ;;  %1864 = vmatprep.mubr.msk.f32.mxu0 %vm80_vm0, %v2565_v2  ;;  %v2833_v14 = vld [vmem:[#allocation19_spill] sm:$0xff] }
 0x133   :  { %1874 = vmatpush3.msra.mxu1 %v2181_v7  ;;  %1865 = vmatmul.mubr.msk.f32.vlgmr.msra.gmra.mxu0 %vm80_vm0, %v2572_v1  ;;  %v2826_v7 = vld [vmem:[#allocation12_spill] sm:$0xff] }
 0x134   :  { %1875 = vmatprep.subr.mxu1 %v2189_v9  ;;  %1886 = vmatprep.subr.mxu0 %v2240_v20 }
 0x135   :  { %1876 = vmatpush3.msra.mxu1 %v2189_v9  ;;  %1887 = vmatpush3.msra.mxu0 %v2240_v20  ;;  %v2828_v9 = vld [vmem:[#allocation14_spill] sm:$0xff] }
 0x136   :  { %1877 = vmatprep.subr.mxu1 %v2197_v11  ;;  %1888 = vmatprep.subr.mxu0 %v2252_v23  ;;  %v2836_v20 = vld [vmem:[#allocation22_spill] sm:$0xff] }
 0x137   :  { %1878 = vmatpush3.msra.mxu1 %v2197_v11  ;;  %1889 = vmatpush3.msra.mxu0 %v2252_v23  ;;  %v2830_v11 = vld [vmem:[#allocation16_spill] sm:$0xff] }
 0x138   :  { %1879 = vmatprep.subr.mxu1 %v2205_v13  ;;  %1890 = vmatprep.subr.mxu0 %v2259_v25 }
 0x139   :  { %1880 = vmatpush3.msra.mxu1 %v2205_v13  ;;  %1891 = vmatpush3.msra.mxu0 %v2259_v25  ;;  %v2832_v13 = vld [vmem:[#allocation18_spill] sm:$0xff] }
 0x13a   :  { %1881 = vmatprep.subr.mxu1 %v2213_v15  ;;  %1892 = vmatprep.subr.mxu0 %v2267_v27 }
 0x13b   :  { %1882 = vmatpush3.msra.mxu1 %v2213_v15  ;;  %1883 = vmatprep.mubr.msk.f32.mxu1 %vm80_vm0, %v1460_v3  ;;  %v2834_v15 = vld [vmem:[#allocation20_spill] sm:$0xff] }
 0x13c   :  { %1893 = vmatpush3.msra.mxu0 %v2267_v27  ;;  %1884 = vmatmul.mubr.msk.f32.vlgmr.msra.gmra.mxu1 %vm80_vm0, %v1461_v4 }
 0x13d   :  { %1894 = vmatprep.subr.mxu0 %v2275_v29  ;;  %1902 = vmatprep.mubr.msk.f32.mxu0 %vm80_vm0, %v1468_v5 }
 0x13e   :  { %1895 = vmatpush3.msra.mxu0 %v2275_v29  ;;  %1905 = vmatprep.subr.mxu1 %v2247_v22  ;;  %v2691_v29 = vld [vmem:[%s2769_s5] ss:$0 sm:$0xff]  ;;  %s2106_s5 = smov [#allocation8]  }
 0x13f   :  { %1896 = vmatprep.subr.mxu0 %v2281_v30  ;;  %1906 = vmatpush3.msra.mxu1 %v2247_v22 }
 0x140   :  { %1897 = vmatpush3.msra.mxu0 %v2281_v30  ;;  %1907 = vmatprep.subr.mxu1 %v2256_v24 }
 0x141   :  { %1898 = vmatprep.subr.mxu0 %v2287_v31  ;;  %1908 = vmatpush3.msra.mxu1 %v2256_v24 }
 0x142   :  { %1899 = vmatpush3.msra.mxu0 %v2287_v31  ;;  %1909 = vmatprep.subr.mxu1 %v2264_v26 }
 0x143   :  { %1900 = vmatprep.subr.mxu0 %v2291_v32  ;;  %1910 = vmatpush3.msra.mxu1 %v2264_v26 }
 0x144   :  { %1901 = vmatpush3.msra.mxu0 %v2291_v32  ;;  %1911 = vmatprep.subr.mxu1 %v2272_v28  ;;  %v2696_v32 = vld [vmem:[%s2770_s6] ss:$0 sm:$0xff]  ;;  %s1436_s6 = sshll.u32 %s2106_s5, 4  ;;  %s1437_s6 = int_to_ptr.vmem [resolvable:$true] %s1436_s6 }
 0x145   :  { %1903 = vmatmul.mubr.msk.f32.vlgmr.msra.gmra.mxu0 %vm80_vm0, %v1469_v6  ;;  %1912 = vmatpush3.msra.mxu1 %v2272_v28  ;;  %s2075_s9 = scalar_lea.vmem %s1437_s6, 512  ;;  %p2080_p11 = scmp.lt.s32.totalorder %s1437_s6, %s1437_s6 }
 0x146   :  { %1913 = vmatprep.subr.mxu1 %v2301_v34  ;;  %1940 = vmatprep.subr.mxu0 %v2303_v35  ;;  %p2076_p10 = scmp.ne.s32.totalorder %s1437_s6, %s2075_s9  ;;  %p2081_p12 = scmp.lt.s32.totalorder %s2075_s9, %s2075_s9 }
 0x147   :  { %1914 = vmatpush3.msra.mxu1 %v2301_v34  ;;  %1941 = vmatpush3.msra.mxu0 %v2303_v35 }
 0x148   :  { %1915 = vmatprep.subr.mxu1 %v2309_v36  ;;  %1942 = vmatprep.subr.mxu0 %v2311_v37  ;;  %p2082_p13 = por %p2081_p12, %p2080_p11 }
 0x149   :  { %1916 = vmatpush3.msra.mxu1 %v2309_v36  ;;  %1943 = vmatpush3.msra.mxu0 %v2311_v37 }
 0x14a   :  { %1917 = vmatprep.subr.mxu1 %v2313_v38  ;;  %1944 = vmatprep.subr.mxu0 %v2317_v39  ;;  %p2083_p0 = pnand %p2082_p13, %p2076_p10 }
 0x14b   :  { %1918 = vmatpush3.msra.mxu1 %v2313_v38  ;;  %1945 = vmatpush3.msra.mxu0 %v2317_v39 }
 0x14c   :  { %1919 = vmatprep.subr.mxu1 %v2321_v40  ;;  %1946 = vmatprep.subr.mxu0 %v2323_v41 }
 0x14d   :  { %1920 = vmatpush3.msra.mxu1 %v2321_v40  ;;  %1947 = vmatpush3.msra.mxu0 %v2323_v41 }
 0x14e   :  { %1921 = vmatprep.subr.mxu1 %v2329_v42  ;;  %1948 = vmatprep.subr.mxu0 %v2331_v43 }
 0x14f   :  { %1922 = vmatpush3.msra.mxu1 %v2329_v42  ;;  %1949 = vmatpush3.msra.mxu0 %v2331_v43 }
 0x150   :  { %1923 = vmatprep.subr.mxu1 %v2337_v44  ;;  %1950 = vmatprep.subr.mxu0 %v2339_v45 }
 0x151   :  { %1924 = vmatpush3.msra.mxu1 %v2337_v44  ;;  %1951 = vmatpush3.msra.mxu0 %v2339_v45 }
 0x152   :  { %1925 = vmatprep.subr.mxu1 %v2345_v46  ;;  %1952 = vmatprep.subr.mxu0 %v2347_v47 }
 0x153   :  { %1926 = vmatpush3.msra.mxu1 %v2345_v46  ;;  %1953 = vmatpush3.msra.mxu0 %v2347_v47 }
 0x154   :  { %1927 = vmatprep.subr.mxu1 %v2353_v48  ;;  %1954 = vmatprep.subr.mxu0 %v2355_v49 }
 0x155   :  { %1928 = vmatpush3.msra.mxu1 %v2353_v48  ;;  %1955 = vmatpush3.msra.mxu0 %v2355_v49 }
 0x156   :  { %1929 = vmatprep.subr.mxu1 %v2365_v50  ;;  %1956 = vmatprep.subr.mxu0 %v2826_v7 }
 0x157   :  { %1930 = vmatpush3.msra.mxu1 %v2365_v50  ;;  %1957 = vmatpush3.msra.mxu0 %v2826_v7 }
 0x158   :  { %1931 = vmatprep.subr.mxu1 %v2827_v8  ;;  %1958 = vmatprep.subr.mxu0 %v2828_v9 }
 0x159   :  { %1932 = vmatpush3.msra.mxu1 %v2827_v8  ;;  %1959 = vmatpush3.msra.mxu0 %v2828_v9 }
 0x15a   :  { %1933 = vmatprep.subr.mxu1 %v2829_v10  ;;  %1960 = vmatprep.subr.mxu0 %v2830_v11 }
 0x15b   :  { %1934 = vmatpush3.msra.mxu1 %v2829_v10  ;;  %1961 = vmatpush3.msra.mxu0 %v2830_v11 }
 0x15c   :  { %1935 = vmatprep.subr.mxu1 %v2831_v12  ;;  %1962 = vmatprep.subr.mxu0 %v2832_v13 }
 0x15d   :  { %1936 = vmatpush3.msra.mxu1 %v2831_v12  ;;  %1963 = vmatpush3.msra.mxu0 %v2832_v13 }
 0x15e   :  { %1975 = vmatprep.subr.mxu1 %v2399_v59  ;;  %1964 = vmatprep.subr.mxu0 %v2833_v14 }
 0x15f   :  { %1965 = vmatpush3.msra.mxu0 %v2833_v14 }
 0x160   :  { %1966 = vmatprep.subr.mxu0 %v2834_v15 }
 0x161   :  { %1967 = vmatpush3.msra.mxu0 %v2834_v15 }
 0x162   :  { %1968 = vmatprep.subr.mxu0 %v2835_v18 }
 0x163   :  { %1969 = vmatpush3.msra.mxu0 %v2835_v18 }
 0x164   :  { %1970 = vmatprep.subr.mxu0 %v2836_v20 }
 0x165   :  { %1971 = vmatpush3.msra.mxu0 %v2836_v20 }
 0x166   :  { %2010 = vmatprep.subr.mxu0 %v2419_v17 }
 0x1c9   :  { %v1758_v22 = vpop.f32.mrf.mxu1 }
 0x1cb   :  { %v451_v24 = vpop.f32.mrf.mxu1 }
 0x1d2   :  { %v1793_v23 = vpop.f32.mrf.mxu0 }
 0x1d3   :  { %v532_v26 = vadd.f32 %v1793_v23, %v1758_v22 }
 0x1d4   :  { %v526_v25 = vpop.f32.mrf.mxu0 }
 0x1d5   :  { %v527_v30 = vadd.f32 %v526_v25, %v451_v24 }
 0x1e2   :  { %v1847_v27 = vpop.f32.mrf.mxu0 }
 0x1e3   :  { %v737_v38 = vadd.f32 %v1847_v27, %v2696_v32 }
 0x1e4   :  { %v731_v37 = vpop.f32.mrf.mxu0 }
 0x1e5   :  { %v732_v41 = vadd.f32 %v2696_v32, %v731_v37 }
 0x1ea   :  { %v1828_v28 = vpop.f32.mrf.mxu1 }
 0x1eb   :  { %v630_v31 = vadd.f32 %v1828_v28, %v532_v26 }
 0x1ec   :  { %v620_v34 = vpop.f32.mrf.mxu1 }
 0x1ed   :  { %v639_v35 = vadd.f32 %v2691_v29, %v630_v31  ;;  %v629_v36 = vadd.f32 %v620_v34, %v527_v30 }
 0x1ef   :  { %v641_v39 = vmax.f32 %v639_v35, 0.0  ;;  %v638_v40 = vadd.f32 %v2691_v29, %v629_v36 }
 0x1f1   :  { %v741_v42 = vadd.f32 %v737_v38, %v641_v39  ;;  %v640_v43 = vmax.f32 %v638_v40, 0.0 }
 0x1f3   :  { %v743_v44 = vmax.f32 %v741_v42, 0.0  ;;  %v740_v45 = vadd.f32 %v732_v41, %v640_v43  ;;  %v1866_v47 = vpop.f32.mrf.mxu0 }
 0x1f5   :  { %745 = vst [vmem:[#allocation8 + $0x8] sm:$0xff] %v743_v44  ;;  %v742_v46 = vmax.f32 %v740_v45, 0.0  ;;  %v839_v49 = vpop.f32.mrf.mxu0 }
 0x1f7   :  { %744 = vst [vmem:[#allocation8] sm:$0xff] %v742_v46 }
 0x1fc   :  { %v1885_v48 = vpop.f32.mrf.mxu1 }
 0x1fd   :  { %v926_v0 = vadd.f32 %v1885_v48, %v1866_v47 }
 0x1fe   :  { %v920_v50 = vpop.f32.mrf.mxu1 }
 0x1ff   :  { %v921_v4 = vadd.f32 %v920_v50, %v839_v49 }
 0x205   :  { %v1904_v3 = vpop.f32.mrf.mxu0 }
 0x206   :  { %v1021_v5 = vadd.f32 %v1904_v3, %v926_v0 }
 0x207   :  { %v1011_v6 = vpop.f32.mrf.mxu0 }
 0x208   :  { %v1030_v7 = vadd.f32 %v2425_v62, %v1021_v5  ;;  %v1020_v8 = vadd.f32 %v1011_v6, %v921_v4 }
 0x20a   :  { %v1032_v9 = vmax.f32 %v1030_v7, 0.0  ;;  %v1029_v10 = vadd.f32 %v2425_v62, %v1020_v8 }
 0x20c   :  { %1035 = vst [vmem:[#allocation2 + $0x21] sm:$0xff] %v1032_v9  ;;  %v1031_v11 = vmax.f32 %v1029_v10, 0.0 }
 0x20e   :  { %1034 = vst [vmem:[#allocation2 + $0x19] sm:$0xff] %v1031_v11  ;;  %1937 = vmatprep.mubr.f32.mxu1 %v1031_v11 }
 0x20f   :  { %1938 = vmatmul.mubr.f32.vlgmr.msra.gmra.mxu1 %v1032_v9 }
 0x210   :  { %1976 = vmatpush3.msra.mxu1 %v2399_v59  ;;  %v2837_v59 = vld [vmem:[#allocation23_spill] sm:$0xff] }
 0x211   :  { %1977 = vmatprep.subr.mxu1 %v2429_v19 }
 0x212   :  { %1978 = vmatpush3.msra.mxu1 %v2429_v19  ;;  %v2838_v19 = vld [vmem:[#allocation24_spill] sm:$0xff] }
 0x213   :  { %1979 = vmatprep.subr.mxu1 %v2432_v21 }
 0x214   :  { %1980 = vmatpush3.msra.mxu1 %v2432_v21  ;;  %v2839_v21 = vld [vmem:[#allocation25_spill] sm:$0xff] }
 0x215   :  { %1981 = vmatprep.subr.mxu1 %v2436_v58  ;;  %v1036_v12 = vld [vmem:[#allocation2 + $0x18] sm:$0xff]  ;;  %v1037_v62 = vld [vmem:[#allocation2 + $0x20] sm:$0xff] }
 0x216   :  { %v1220_v13 = vld [vmem:[#allocation2 + $0x1a] sm:$0xff]  ;;  %1982 = vmatpush3.msra.mxu1 %v2436_v58  ;;  %1972 = vmatprep.mubr.f32.mxu0 %v1036_v12  ;;  %v2841_v58 = vld [vmem:[#allocation27_spill] sm:$0xff] }
 0x217   :  { %1983 = vmatprep.subr.mxu1 %v2440_v52  ;;  %2007 = vmatprep.mubr.f32.mxu1 %v1220_v13 }
 0x218   :  { %1973 = vmatmul.mubr.f32.vlgmr.msra.gmra.mxu0 %v1037_v62  ;;  %1984 = vmatpush3.msra.mxu1 %v2440_v52  ;;  %v2842_v52 = vld [vmem:[#allocation28_spill] sm:$0xff] }
 0x219   :  { %1985 = vmatprep.subr.mxu1 %v2444_v55  ;;  %2011 = vmatpush3.msra.mxu0 %v2419_v17  ;;  %v2840_v17 = vld [vmem:[#allocation26_spill] sm:$0xff] }
 0x21a   :  { %1986 = vmatpush3.msra.mxu1 %v2444_v55  ;;  %2012 = vmatprep.subr.mxu0 %v2450_v56  ;;  %v2843_v55 = vld [vmem:[#allocation29_spill] sm:$0xff] }
 0x21b   :  { %1987 = vmatprep.subr.mxu1 %v2453_v57  ;;  %2013 = vmatpush3.msra.mxu0 %v2450_v56  ;;  %v1221_v56 = vld [vmem:[#allocation2 + $0x22] sm:$0xff] }
 0x21c   :  { %1988 = vmatpush3.msra.mxu1 %v2453_v57  ;;  %2014 = vmatprep.subr.mxu0 %v2837_v59 }
 0x21d   :  { %1989 = vmatprep.subr.mxu1 %v2838_v19  ;;  %2015 = vmatpush3.msra.mxu0 %v2837_v59 }
 0x21e   :  { %1990 = vmatpush3.msra.mxu1 %v2838_v19  ;;  %2016 = vmatprep.subr.mxu0 %v2839_v21 }
 0x21f   :  { %1991 = vmatprep.subr.mxu1 %v2475_v60  ;;  %2017 = vmatpush3.msra.mxu0 %v2839_v21 }
 0x220   :  { %1992 = vmatpush3.msra.mxu1 %v2475_v60  ;;  %2018 = vmatprep.subr.mxu0 %v2840_v17 }
 0x221   :  { %1993 = vmatprep.subr.mxu1 %v2841_v58  ;;  %2019 = vmatpush3.msra.mxu0 %v2840_v17 }
 0x222   :  { %1994 = vmatpush3.msra.mxu1 %v2841_v58  ;;  %2020 = vmatprep.subr.mxu0 %v2842_v52 }
 0x223   :  { %1995 = vmatprep.subr.mxu1 %v2497_v61  ;;  %2021 = vmatpush3.msra.mxu0 %v2842_v52 }
 0x224   :  { %1996 = vmatpush3.msra.mxu1 %v2497_v61  ;;  %2022 = vmatprep.subr.mxu0 %v2843_v55 }
 0x225   :  { %1997 = vmatprep.subr.mxu1 %v2508_v63  ;;  %2023 = vmatpush3.msra.mxu0 %v2843_v55 }
 0x226   :  { %1998 = vmatpush3.msra.mxu1 %v2508_v63  ;;  %2024 = vmatprep.subr.mxu0 %v2515_v51 }
 0x227   :  { %1999 = vmatprep.subr.mxu1 %v2521_v53  ;;  %2025 = vmatpush3.msra.mxu0 %v2515_v51 }
 0x228   :  { %2000 = vmatpush3.msra.mxu1 %v2521_v53  ;;  %2026 = vmatprep.mubr.msk.f32.mxu0 %vm80_vm0, %v2565_v2 }
 0x229   :  { %2001 = vmatprep.subr.mxu1 %v2528_v54  ;;  %2027 = vmatmul.mubr.msk.f32.vlgmr.msra.gmra.mxu0 %vm80_vm0, %v2572_v1 }
 0x22a   :  { %2002 = vmatpush3.msra.mxu1 %v2528_v54 }
 0x22b   :  { %2003 = vmatprep.subr.mxu1 %v2535_v33 }
 0x22c   :  { %2004 = vmatpush3.msra.mxu1 %v2535_v33 }
 0x22d   :  { %2005 = vmatprep.subr.mxu1 %v2541_v16 }
 0x22e   :  { %2006 = vmatpush3.msra.mxu1 %v2541_v16 }
 0x22f   :  { %2008 = vmatmul.mubr.f32.vlgmr.msra.gmra.mxu1 %v1221_v56 }
 0x2cf   :  { %v1939_v57 = vpop.f32.mrf.mxu1 }
 0x2d1   :  { %v1136_v63 = vpop.f32.mrf.mxu1 }
 0x2d8   :  { %v1974_v61 = vpop.f32.mrf.mxu0 }
 0x2d9   :  { %v1217_v51 = vadd.f32 %v1974_v61, %v1939_v57 }
 0x2da   :  { %v1211_v60 = vpop.f32.mrf.mxu0 }
 0x2db   :  { %v1212_v1 = vadd.f32 %v1211_v60, %v1136_v63 }
 0x2e9   :  { %v2028_v2 = vpop.f32.mrf.mxu0 }
 0x2ea   :  { %v1421_v33 = vadd.f32 %v2028_v2, %v2696_v32 }
 0x2eb   :  { %v1415_v20 = vpop.f32.mrf.mxu0 }
 0x2ec   :  { %v1416_v25 = vadd.f32 %v2696_v32, %v1415_v20 }
 0x2ef   :  { %v2009_v53 = vpop.f32.mrf.mxu1 }
 0x2f0   :  { %v1314_v14 = vadd.f32 %v2009_v53, %v1217_v51 }
 0x2f1   :  { %v1304_v54 = vpop.f32.mrf.mxu1 }
 0x2f2   :  { %v1323_v15 = vadd.f32 %v2691_v29, %v1314_v14  ;;  %v1313_v18 = vadd.f32 %v1304_v54, %v1212_v1 }
 0x2f4   :  { %v1325_v22 = vmax.f32 %v1323_v15, 0.0  ;;  %v1322_v16 = vadd.f32 %v2691_v29, %v1313_v18 }
 0x2f6   :  { %v1324_v23 = vmax.f32 %v1322_v16, 0.0  ;;  %v1425_v24 = vadd.f32 %v1421_v33, %v1325_v22 }
 0x2f8   :  { %v1427_v26 = vmax.f32 %v1425_v24, 0.0  ;;  %v1424_v27 = vadd.f32 %v1416_v25, %v1324_v23 }
 0x2fa   :  { %1430 = vst [vmem:[#allocation8 + $0x18] sm:$0xff] %v1427_v26  ;;  %v1426_v28 = vmax.f32 %v1424_v27, 0.0 }
 0x2fc   :  { %1429 = vst [vmem:[#allocation8 + $0x10] sm:$0xff] %v1426_v28 }
 0x2fd   :  { %2086 = shalt.err (!%p2083_p0)
}
 0x2fe   :  { %1442 = dma.vmem_to_hbm [thread:$0]  %s1437_s6, 512, %s2771_s7, [#allocation5], %s2102_s27, %s2102_s27, %s2103_s28  }
 0x2ff   :  { %2099 = dma.done.wait [#allocation5], 512  }
 0x300   :  { %2100 = vsyncadd [#allocation5], 4294966784 }
 0x301   :  { %1446 = vsyncpa [#allocation4], 1 }
 0x302   :  { %1447 = vsyncpa [#allocation7], 1 }
 0x303   :  { %1448 = vsyncpa [#allocation5], 1 }

</bundles_post_ra>
